<compile_context>
chip_gen: v7x
topology: tpu7x:2x2x1
jax: 0.10.0
libtpu: 0.0.40
codegen_flags: <defaults>
</compile_context>

<pallas_src>
import jax
import jax.numpy as jnp
from jax.experimental import pallas as pl
from jax.experimental.pallas import tpu as pltpu

LANE = 128
TB_MAX = 512  # batch tile upper bound (multiple of 256 for v6e/v7x MXU)


def _round_up(n, m):
    return ((n + m - 1) // m) * m


def mlp_logsoftmax_kernel(x_ref, w1_ref, b1_ref, w2_ref, b2_ref,
                          wo_ref, bo_ref, o_ref):
    # f32 -> bf16 cast in-kernel (input stays unpadded f32 in HBM)
    x = x_ref[...].astype(jnp.bfloat16)
    # hidden layer 1: relu(x @ W1 + b1)   (bf16 operands, f32 accumulate)
    h = jnp.dot(x, w1_ref[...], preferred_element_type=jnp.float32)
    h = jnp.maximum(h + b1_ref[...], 0.0)
    # hidden layer 2: relu(h @ W2 + b2)
    h = jnp.dot(h.astype(jnp.bfloat16), w2_ref[...],
                preferred_element_type=jnp.float32)
    h = jnp.maximum(h + b2_ref[...], 0.0)
    # output layer (padded class lanes carry a -1e30 bias -> excluded below)
    logits = jnp.dot(h.astype(jnp.bfloat16), wo_ref[...],
                     preferred_element_type=jnp.float32)
    logits = logits + bo_ref[...]
    # numerically stable log_softmax (f32) over the lane-dense class axis
    m = jnp.max(logits, axis=-1, keepdims=True)
    shifted = logits - m
    lse = jnp.log(jnp.sum(jnp.exp(shifted), axis=-1, keepdims=True))
    o_ref[...] = (shifted - lse).astype(o_ref.dtype)  # bf16 store, lane-dense


def _pick_tb(B):
    TB = min(TB_MAX, _round_up(B, 8))
    # v7x has 2 TensorCores sharing the "parallel" grid axis: when the batch is
    # big enough to split usefully but would otherwise be a single tile, use 2.
    if B > 256 and B <= TB_MAX:
        TB = _round_up(-(-B // 2), 8)
    return TB


def classifier_forward(x, prepared):
    """x: [B, input_size] f32. prepared: dict from prepare_params()."""
    B, in_size = x.shape
    h1_p = prepared["w1"].shape[1]
    h2_p = prepared["w2"].shape[1]
    out_p = prepared["wo"].shape[1]
    out_size = prepared["out_size"]

    TB = _pick_tb(B)
    B_p = _round_up(B, TB)
    if B_p != B:  # pad only the batch axis (padded rows sliced off afterwards)
        x = jnp.pad(x, ((0, B_p - B), (0, 0)))

    # Advisory cost hint so XLA overlaps surrounding ops with the custom call.
    flops = 2 * B_p * (in_size * h1_p + h1_p * h2_p + h2_p * out_p)
    bytes_accessed = (
        B_p * in_size * 4                                           # x (f32)
        + 2 * (prepared["w1"].size + prepared["w2"].size
               + prepared["wo"].size)                               # bf16 weights
        + 4 * (prepared["b1"].size + prepared["b2"].size
               + prepared["bo"].size)                               # f32 biases
        + B_p * out_p * 2)                                          # out (bf16)
    cost = pl.CostEstimate(flops=flops, transcendentals=B_p * out_p,
                           bytes_accessed=bytes_accessed)

    grid = (B_p // TB,)
    out = pl.pallas_call(
        mlp_logsoftmax_kernel,
        out_shape=jax.ShapeDtypeStruct((B_p, out_p), jnp.bfloat16),
        grid_spec=pltpu.PrefetchScalarGridSpec(
            num_scalar_prefetch=0,
            grid=grid,
            in_specs=[
                pl.BlockSpec((TB, in_size), lambda i: (i, 0)),    # x tile (f32)
                pl.BlockSpec((in_size, h1_p), lambda i: (0, 0)),  # W1 (resident)
                pl.BlockSpec((1, h1_p), lambda i: (0, 0)),        # b1
                pl.BlockSpec((h1_p, h2_p), lambda i: (0, 0)),     # W2 (resident)
                pl.BlockSpec((1, h2_p), lambda i: (0, 0)),        # b2
                pl.BlockSpec((h2_p, out_p), lambda i: (0, 0)),    # Wo (resident)
                pl.BlockSpec((1, out_p), lambda i: (0, 0)),       # bo
            ],
            out_specs=pl.BlockSpec((TB, out_p), lambda i: (i, 0)),
        ),
        compiler_params=pltpu.CompilerParams(
            dimension_semantics=("parallel",)),
        cost_estimate=cost,
    )(x, prepared["w1"], prepared["b1"], prepared["w2"], prepared["b2"],
      prepared["wo"], prepared["bo"])
    # Slice off batch padding / padded class lanes; return f32 like the module.
    return out[:B, :out_size].astype(jnp.float32)


def init_params(key, input_size, hidden_layers, output_size):
    """Deterministic nn.Linear-style init. Weights stored [in, out] f32."""
    ks = jax.random.split(key, 6)
    h1, h2 = hidden_layers

    def lin(kw, kb, fan_in, fan_out):
        bound = 1.0 / jnp.sqrt(fan_in)
        w = jax.random.uniform(kw, (fan_in, fan_out), jnp.float32, -bound, bound)
        b = jax.random.uniform(kb, (1, fan_out), jnp.float32, -bound, bound)
        return w, b

    w1, b1 = lin(ks[0], ks[1], input_size, h1)
    w2, b2 = lin(ks[2], ks[3], h1, h2)
    wo, bo = lin(ks[4], ks[5], h2, output_size)
    return {"w1": w1, "b1": b1, "w2": w2, "b2": b2, "wo": wo, "bo": bo}


def prepare_params(params, input_size, output_size):
    """Pad hidden/output feature dims to multiples of 128, cast weights to bf16.

    W1 keeps its *unpadded* input dim (x is passed unpadded). Biases stay f32
    (added to the f32 accumulator). Padded class lanes of the output bias are
    -1e30 so log_softmax ignores them.
    """
    h1 = params["w1"].shape[1]
    h2 = params["w2"].shape[1]
    h1_p = _round_up(h1, LANE)
    h2_p = _round_up(h2, LANE)
    out_p = _round_up(output_size, LANE)

    def pad_w(w, rp, cp):
        r, c = w.shape
        return jnp.zeros((rp, cp), jnp.bfloat16).at[:r, :c].set(
            w.astype(jnp.bfloat16))

    def pad_b(b, cp, fill=0.0):
        c = b.shape[1]
        return jnp.full((1, cp), fill, jnp.float32).at[:, :c].set(
            b.astype(jnp.float32))

    return {
        "w1": pad_w(params["w1"], input_size, h1_p),  # input dim NOT padded
        "b1": pad_b(params["b1"], h1_p),
        "w2": pad_w(params["w2"], h1_p, h2_p),
        "b2": pad_b(params["b2"], h2_p),
        "wo": pad_w(params["wo"], h2_p, out_p),
        "bo": pad_b(params["bo"], out_p, fill=-1e30),
        "out_size": output_size,
    }


def ref_forward(x, params):
    """Pure-JAX reference with the same bf16-operand / f32-accumulate math."""
    xb = x.astype(jnp.bfloat16)
    w1 = params["w1"].astype(jnp.bfloat16)
    w2 = params["w2"].astype(jnp.bfloat16)
    wo = params["wo"].astype(jnp.bfloat16)
    h = jnp.maximum(
        jnp.dot(xb, w1, preferred_element_type=jnp.float32) + params["b1"], 0.0)
    h = jnp.maximum(
        jnp.dot(h.astype(jnp.bfloat16), w2,
                preferred_element_type=jnp.float32) + params["b2"], 0.0)
    logits = jnp.dot(h.astype(jnp.bfloat16), wo,
                     preferred_element_type=jnp.float32) + params["bo"]
    return jax.nn.log_softmax(logits, axis=1)


if __name__ == "__main__":
    # Small shapes consistent with the module: 2 hidden layers.
    batch, input_size, hidden_layers, output_size = 8, 32, [64, 48], 10

    key = jax.random.PRNGKey(0)
    k_x, k_p = jax.random.split(key)
    x = jax.random.normal(k_x, (batch, input_size), jnp.float32)
    params = init_params(k_p, input_size, hidden_layers, output_size)
    prepared = prepare_params(params, input_size, output_size)

    out = classifier_forward(x, prepared)
    out = jax.block_until_ready(out)

    assert out.shape == (batch, output_size)
    ref = ref_forward(x, params)
    # bf16 output store adds ~|logprob|*2^-9 rounding on top of bf16 matmuls.
    assert jnp.allclose(out, ref, atol=3e-2, rtol=2e-2), float(
        jnp.max(jnp.abs(out - ref)))
    # log-probs must exponentiate to (approximately) a valid distribution
    assert jnp.allclose(jnp.sum(jnp.exp(out), axis=1), 1.0, atol=2e-2)

    print("KERNEL_OK")
</pallas_src>

<mosaic_0001>
module attributes {stable_mosaic.version = 11 : i64} {
  func.func @mlp_logsoftmax_kernel(%arg0: i32, %arg1: memref<8x32xf32, #tpu.memory_space<vmem>>, %arg2: memref<32x128xbf16, #tpu.memory_space<vmem>>, %arg3: memref<1x128xf32, #tpu.memory_space<vmem>>, %arg4: memref<128x128xbf16, #tpu.memory_space<vmem>>, %arg5: memref<1x128xf32, #tpu.memory_space<vmem>>, %arg6: memref<128x128xbf16, #tpu.memory_space<vmem>>, %arg7: memref<1x128xf32, #tpu.memory_space<vmem>>, %arg8: memref<8x128xbf16, #tpu.memory_space<vmem>>) attributes {dimension_semantics = [#tpu.dimension_semantics<parallel>], iteration_bounds = array<i64: 1>, scalar_prefetch = 0 : i64, scratch_operands = 0 : i64, tpu.core_type = #tpu.core_type<tc>, window_params = [{transform_indices = @transform_0, window_bounds = array<i64: 8, 32>}, {pipeline_mode = #tpu.pipeline_mode<synchronous>, transform_indices = @transform_1, window_bounds = array<i64: 32, 128>}, {pipeline_mode = #tpu.pipeline_mode<synchronous>, transform_indices = @transform_2, window_bounds = array<i64: 1, 128>}, {pipeline_mode = #tpu.pipeline_mode<synchronous>, transform_indices = @transform_3, window_bounds = array<i64: 128, 128>}, {pipeline_mode = #tpu.pipeline_mode<synchronous>, transform_indices = @transform_4, window_bounds = array<i64: 1, 128>}, {pipeline_mode = #tpu.pipeline_mode<synchronous>, transform_indices = @transform_5, window_bounds = array<i64: 128, 128>}, {pipeline_mode = #tpu.pipeline_mode<synchronous>, transform_indices = @transform_6, window_bounds = array<i64: 1, 128>}, {transform_indices = @transform_7, window_bounds = array<i64: 8, 128>}]} {
    %c0 = arith.constant 0 : index
    %c0_0 = arith.constant 0 : index
    %0 = vector.load %arg1[%c0, %c0_0] : memref<8x32xf32, #tpu.memory_space<vmem>>, vector<8x32xf32>
    %1 = arith.truncf %0 : vector<8x32xf32> to vector<8x32xbf16>
    %c0_1 = arith.constant 0 : index
    %c0_2 = arith.constant 0 : index
    %2 = vector.load %arg2[%c0_1, %c0_2] : memref<32x128xbf16, #tpu.memory_space<vmem>>, vector<32x128xbf16>
    %cst = arith.constant dense<0.000000e+00> : vector<8x128xf32>
    %3 = tpu.matmul %1, %2, %cst {dimension_numbers = #tpu.dot_dimension_numbers<[1], [0], [0], [1], [0, 0, 1, 1], [], []>} : vector<8x32xbf16>, vector<32x128xbf16>, vector<8x128xf32> -> vector<8x128xf32>
    %c0_3 = arith.constant 0 : index
    %c0_4 = arith.constant 0 : index
    %4 = vector.load %arg3[%c0_3, %c0_4] : memref<1x128xf32, #tpu.memory_space<vmem>>, vector<1x128xf32>
    %5 = vector.broadcast %4 : vector<1x128xf32> to vector<8x128xf32>
    %6 = arith.addf %3, %5 : vector<8x128xf32>
    %cst_5 = arith.constant 0.000000e+00 : f32
    %7 = vector.broadcast %cst_5 : f32 to vector<8x128xf32>
    %8 = arith.maximumf %6, %7 : vector<8x128xf32>
    %9 = arith.truncf %8 : vector<8x128xf32> to vector<8x128xbf16>
    %c0_6 = arith.constant 0 : index
    %c0_7 = arith.constant 0 : index
    %10 = vector.load %arg4[%c0_6, %c0_7] : memref<128x128xbf16, #tpu.memory_space<vmem>>, vector<128x128xbf16>
    %cst_8 = arith.constant dense<0.000000e+00> : vector<8x128xf32>
    %11 = tpu.matmul %9, %10, %cst_8 {dimension_numbers = #tpu.dot_dimension_numbers<[1], [0], [0], [1], [0, 0, 1, 1], [], []>} : vector<8x128xbf16>, vector<128x128xbf16>, vector<8x128xf32> -> vector<8x128xf32>
    %c0_9 = arith.constant 0 : index
    %c0_10 = arith.constant 0 : index
    %12 = vector.load %arg5[%c0_9, %c0_10] : memref<1x128xf32, #tpu.memory_space<vmem>>, vector<1x128xf32>
    %13 = vector.broadcast %12 : vector<1x128xf32> to vector<8x128xf32>
    %14 = arith.addf %11, %13 : vector<8x128xf32>
    %cst_11 = arith.constant 0.000000e+00 : f32
    %15 = vector.broadcast %cst_11 : f32 to vector<8x128xf32>
    %16 = arith.maximumf %14, %15 : vector<8x128xf32>
    %17 = arith.truncf %16 : vector<8x128xf32> to vector<8x128xbf16>
    %c0_12 = arith.constant 0 : index
    %c0_13 = arith.constant 0 : index
    %18 = vector.load %arg6[%c0_12, %c0_13] : memref<128x128xbf16, #tpu.memory_space<vmem>>, vector<128x128xbf16>
    %cst_14 = arith.constant dense<0.000000e+00> : vector<8x128xf32>
    %19 = tpu.matmul %17, %18, %cst_14 {dimension_numbers = #tpu.dot_dimension_numbers<[1], [0], [0], [1], [0, 0, 1, 1], [], []>} : vector<8x128xbf16>, vector<128x128xbf16>, vector<8x128xf32> -> vector<8x128xf32>
    %c0_15 = arith.constant 0 : index
    %c0_16 = arith.constant 0 : index
    %20 = vector.load %arg7[%c0_15, %c0_16] : memref<1x128xf32, #tpu.memory_space<vmem>>, vector<1x128xf32>
    %21 = vector.broadcast %20 : vector<1x128xf32> to vector<8x128xf32>
    %22 = arith.addf %19, %21 : vector<8x128xf32>
    %cst_17 = arith.constant dense<0xFF800000> : vector<8xf32>
    %23 = vector.multi_reduction <maximumf>, %22, %cst_17 [1] : vector<8x128xf32> to vector<8xf32>
    %24 = vector.shape_cast %23 : vector<8xf32> to vector<8x1xf32>
    %25 = vector.broadcast %24 : vector<8x1xf32> to vector<8x128xf32>
    %26 = arith.subf %22, %25 : vector<8x128xf32>
    %27 = math.exp %26 : vector<8x128xf32>
    %cst_18 = arith.constant dense<0.000000e+00> : vector<8xf32>
    %28 = vector.multi_reduction <add>, %27, %cst_18 [1] : vector<8x128xf32> to vector<8xf32>
    %29 = vector.shape_cast %28 : vector<8xf32> to vector<8x1xf32>
    %30 = math.log %29 : vector<8x1xf32>
    %31 = vector.broadcast %30 : vector<8x1xf32> to vector<8x128xf32>
    %32 = arith.subf %26, %31 : vector<8x128xf32>
    %33 = arith.truncf %32 : vector<8x128xf32> to vector<8x128xbf16>
    %c0_19 = arith.constant 0 : index
    %c0_20 = arith.constant 0 : index
    %34 = vector.load %arg8[%c0_19, %c0_20] : memref<8x128xbf16, #tpu.memory_space<vmem>>, vector<8x128xbf16>
    tpu.vector_store %arg8[%c0_19, %c0_20], %33 {strides = array<i32>} : memref<8x128xbf16, #tpu.memory_space<vmem>>, vector<8x128xbf16>,
    return
  }
  func.func @transform_0(%arg0: i32) -> (i32, i32) {
    %c0_i32 = arith.constant 0 : i32
    %c0_i32_0 = arith.constant 0 : i32
    return %arg0, %c0_i32 : i32, i32
  }
  func.func @transform_1(%arg0: i32) -> (i32, i32) {
    %c0_i32 = arith.constant 0 : i32
    %c0_i32_0 = arith.constant 0 : i32
    %c0_i32_1 = arith.constant 0 : i32
    return %c0_i32, %c0_i32_0 : i32, i32
  }
  func.func @transform_2(%arg0: i32) -> (i32, i32) {
    %c0_i32 = arith.constant 0 : i32
    %c0_i32_0 = arith.constant 0 : i32
    %c0_i32_1 = arith.constant 0 : i32
    return %c0_i32, %c0_i32_0 : i32, i32
  }
  func.func @transform_3(%arg0: i32) -> (i32, i32) {
    %c0_i32 = arith.constant 0 : i32
    %c0_i32_0 = arith.constant 0 : i32
    %c0_i32_1 = arith.constant 0 : i32
    return %c0_i32, %c0_i32_0 : i32, i32
  }
  func.func @transform_4(%arg0: i32) -> (i32, i32) {
    %c0_i32 = arith.constant 0 : i32
    %c0_i32_0 = arith.constant 0 : i32
    %c0_i32_1 = arith.constant 0 : i32
    return %c0_i32, %c0_i32_0 : i32, i32
  }
  func.func @transform_5(%arg0: i32) -> (i32, i32) {
    %c0_i32 = arith.constant 0 : i32
    %c0_i32_0 = arith.constant 0 : i32
    %c0_i32_1 = arith.constant 0 : i32
    return %c0_i32, %c0_i32_0 : i32, i32
  }
  func.func @transform_6(%arg0: i32) -> (i32, i32) {
    %c0_i32 = arith.constant 0 : i32
    %c0_i32_0 = arith.constant 0 : i32
    %c0_i32_1 = arith.constant 0 : i32
    return %c0_i32, %c0_i32_0 : i32, i32
  }
  func.func @transform_7(%arg0: i32) -> (i32, i32) {
    %c0_i32 = arith.constant 0 : i32
    %c0_i32_0 = arith.constant 0 : i32
    return %arg0, %c0_i32 : i32, i32
  }
}

</mosaic_0001>

<bundles_post_ra>
// kernel: tpu_custom_call.1
= control target key start
LH: loop header
LB: loop body
LE: loop exit
PB: predicated region body
PF: predicated region fallthrough
CT: control target
= control target key end

     0   :  { %12 = vsyncpa [#allocation3], 0  ;;  %s796_s0 = inlined_call_operand.hbm [shape: f32[8,32], index: 0, kind: input, shape index: {}]   ;;  %s797_s1 = inlined_call_operand.hbm [shape: bf16[32,128], index: 1, kind: input, shape index: {}]   ;;  %s798_s2 = inlined_call_operand.vmem [shape: f32[1,128], index: 2, kind: input, shape index: {}]   ;;  %s799_s3 = inlined_call_operand.hbm [shape: bf16[128,128], index: 3, kind: input, shape index: {}]   ;;  %s800_s4 = inlined_call_operand.vmem [shape: f32[1,128], index: 4, kind: input, shape index: {}]   ;;  %s801_s5 = inlined_call_operand.hbm [shape: bf16[128,128], index: 5, kind: input, shape index: {}]   ;;  %s802_s6 = inlined_call_operand.vmem [shape: f32[1,128], index: 6, kind: input, shape index: {}]   ;;  %s803_s7 = inlined_call_operand.hbm [shape: bf16[8,128], index: 7, kind: output, shape index: {}]  }
   0x1   :  { %13 = vsyncpa [#allocation6], 0 }
   0x2   :  { %14 = vsyncpa [#allocation9], 0 }
   0x3   :  { %15 = vsyncpa [#allocation4], 0  ;;  %s645_s24 = smov [#allocation5]   ;;  %s527_s28 = scalar_lea.hbm %s797_s1, 256 }
   0x4   :  { %s31_s25 = sshll.u32 %s645_s24, 4  ;;  %p528_p0 = scmp.ne.s32.totalorder %s797_s1, %s527_s28  ;;  %s32_s25 = int_to_ptr.vmem [resolvable:$true] %s31_s25 }
   0x5   :  { %p531_p1 = scmp.lt.u32.totalorder %s527_s28, %s797_s1 }
   0x7   :  { %p533_p2 = pnand %p531_p1, %p528_p0 }
   0x9   :  { %536 = shalt.err (!%p533_p2)
}
   0xa   :  { %s537_s10 = scalar_lea.vmem %s32_s25, 256  ;;  %p542_p4 = scmp.lt.s32.totalorder %s32_s25, %s32_s25 }
   0xb   :  { %p538_p3 = scmp.ne.s32.totalorder %s32_s25, %s537_s10  ;;  %p543_p5 = scmp.lt.s32.totalorder %s537_s10, %s537_s10 }
   0xd   :  { %p544_p6 = por %p543_p5, %p542_p4 }
   0xf   :  { %p545_p7 = pnand %p544_p6, %p538_p3 }
  0x11   :  { %548 = shalt.err (!%p545_p7)
}
  0x12   :  { %s646_s11 = smov 64   ;;  %s647_s12 = smov 4  }
  0x13   :  { %37 = dma.hbm_to_vmem [thread:$0]  %s797_s1, 256, %s32_s25, [#allocation6], %s646_s11, %s646_s11, %s647_s12  }
  0x14   :  { %s648_s15 = smov [#allocation2]   ;;  %s649_s17 = smov [#allocation7]  }
  0x15   :  { %s22_s16 = sshll.u32 %s648_s15, 4  ;;  %s45_s18 = sshll.u32 %s649_s17, 4  ;;  %s23_s16 = int_to_ptr.vmem [resolvable:$true] %s22_s16  ;;  %s46_s18 = int_to_ptr.vmem [resolvable:$true] %s45_s18 }
  0x16   :  { %s549_s21 = scalar_lea.hbm %s796_s0, 128 }
  0x17   :  { %p550_p8 = scmp.ne.s32.totalorder %s796_s0, %s549_s21  ;;  %p553_p9 = scmp.lt.u32.totalorder %s549_s21, %s796_s0 }
  0x19   :  { %p555_p10 = pnand %p553_p9, %p550_p8 }
  0x1b   :  { %558 = shalt.err (!%p555_p10)
}
  0x1c   :  { %s559_s1 = scalar_lea.vmem %s23_s16, 128  ;;  %p564_p12 = scmp.lt.s32.totalorder %s23_s16, %s23_s16 }
  0x1d   :  { %p560_p11 = scmp.ne.s32.totalorder %s23_s16, %s559_s1  ;;  %p565_p13 = scmp.lt.s32.totalorder %s559_s1, %s559_s1 }
  0x1f   :  { %p566_p0 = por %p565_p13, %p564_p12 }
  0x21   :  { %p567_p1 = pnand %p566_p0, %p560_p11 }
  0x23   :  { %570 = shalt.err (!%p567_p1)
}
  0x24   :  { %25 = dma.hbm_to_vmem [thread:$0]  %s796_s0, 128, %s23_s16, [#allocation3]  }
  0x25   :  { %s571_s30 = scalar_lea.hbm %s799_s3, 1024 }
  0x26   :  { %p572_p2 = scmp.ne.s32.totalorder %s799_s3, %s571_s30  ;;  %p575_p3 = scmp.lt.u32.totalorder %s571_s30, %s799_s3 }
  0x28   :  { %p577_p4 = pnand %p575_p3, %p572_p2 }
  0x2a   :  { %580 = shalt.err (!%p577_p4)
}
  0x2b   :  { %s581_s14 = scalar_lea.vmem %s46_s18, 1024  ;;  %p586_p6 = scmp.lt.s32.totalorder %s46_s18, %s46_s18 }
  0x2c   :  { %p582_p5 = scmp.ne.s32.totalorder %s46_s18, %s581_s14  ;;  %p587_p7 = scmp.lt.s32.totalorder %s581_s14, %s581_s14 }
  0x2e   :  { %p588_p8 = por %p587_p7, %p586_p6 }
  0x30   :  { %p589_p9 = pnand %p588_p8, %p582_p5 }
  0x32   :  { %592 = shalt.err (!%p589_p9)
}
  0x33   :  { %51 = dma.hbm_to_vmem [thread:$0]  %s799_s3, 1024, %s46_s18, [#allocation6], %s646_s11, %s646_s11, %s647_s12  }
  0x34   :  { %s650_s16 = smov [#allocation8]   ;;  %s593_s21 = scalar_lea.hbm %s801_s5, 1024 }
  0x35   :  { %s59_s17 = sshll.u32 %s650_s16, 4  ;;  %p594_p10 = scmp.ne.s32.totalorder %s801_s5, %s593_s21  ;;  %s60_s17 = int_to_ptr.vmem [resolvable:$true] %s59_s17 }
  0x36   :  { %p597_p11 = scmp.lt.u32.totalorder %s593_s21, %s801_s5 }
  0x38   :  { %p599_p12 = pnand %p597_p11, %p594_p10 }
  0x3a   :  { %602 = shalt.err (!%p599_p12)
}
  0x3b   :  { %s603_s1 = scalar_lea.vmem %s60_s17, 1024  ;;  %p608_p0 = scmp.lt.s32.totalorder %s60_s17, %s60_s17 }
  0x3c   :  { %p604_p13 = scmp.ne.s32.totalorder %s60_s17, %s603_s1  ;;  %p609_p1 = scmp.lt.s32.totalorder %s603_s1, %s603_s1 }
  0x3e   :  { %p610_p2 = por %p609_p1, %p608_p0 }
  0x40   :  { %p611_p3 = pnand %p610_p2, %p604_p13 }
  0x42   :  { %614 = shalt.err (!%p611_p3)
}
  0x43   :  { %65 = dma.hbm_to_vmem [thread:$0]  %s801_s5, 1024, %s60_s17, [#allocation9], %s646_s11, %s646_s11, %s647_s12  }
  0x44   :  { %637 = dma.done.wait [#allocation3], 128  }
  0x45   :  { %638 = vsyncadd [#allocation3], 4294967168 }
  0x46   :  { %639 = dma.done.wait [#allocation6], 1280  }
  0x47   :  { %640 = vsyncadd [#allocation6], 4294966016 }
  0x48   :  { %641 = dma.done.wait [#allocation9], 1024  }
  0x49   :  { %642 = vsyncadd [#allocation9], 4294966272  ;;  %v651_v0 = vmov 0.0   ;;  %vm652_vm0 = vmmov 0   ;;  %v505_v1 = vld [vmem:[#allocation5] sm:$0xff]   ;;  %v506_v2 = vld [vmem:[#allocation5 + $0x8] sm:$0xff]  }
  0x4a   :  { %448 = vmatprep.subr.bf16.mxu0 %v651_v0  ;;  %452 = vmatprep.mubr.msk.bf16.mxu0 %vm652_vm0, %v651_v0  ;;  %v81_v3 = vld [vmem:[#allocation2] sm:$0xff]  ;;  %v507_v4 = vld [vmem:[#allocation7] sm:$0xff]   ;;  %vm106_vm1 = vcmask 261120   ;;  %v509_v7 = vld [vmem:[#allocation7 + $0x10] sm:$0xff]  }
  0x4b   :  { %456 = vmatprep.subr.bf16.mxu1 %v651_v0  ;;  %472 = vmatprep.mubr.msk.bf16.mxu1 %vm652_vm0, %v651_v0  ;;  %v82_v5 = vpack.c.bf16 %v81_v3, %v81_v3  ;;  %v508_v6 = vld [vmem:[#allocation7 + $0x8] sm:$0xff]   ;;  %v510_v8 = vld [vmem:[#allocation7 + $0x18] sm:$0xff]   ;;  %v511_v9 = vld [vmem:[#allocation7 + $0x20] sm:$0xff]  }
  0x4c   :  { %449 = vmatpush3.bf16.msra.mxu0 %v505_v1  ;;  %457 = vmatpush3.bf16.msra.mxu1 %v507_v4  ;;  %v512_v10 = vld [vmem:[#allocation7 + $0x28] sm:$0xff]   ;;  %v513_v11 = vld [vmem:[#allocation7 + $0x30] sm:$0xff]   ;;  %v514_v12 = vld [vmem:[#allocation7 + $0x38] sm:$0xff]  }
  0x4d   :  { %450 = vmatprep.subr.bf16.mxu0 %v651_v0  ;;  %458 = vmatprep.subr.bf16.mxu1 %v651_v0  ;;  %v515_v13 = vld [vmem:[#allocation8] sm:$0xff]   ;;  %v516_v14 = vld [vmem:[#allocation8 + $0x8] sm:$0xff]   ;;  %v517_v15 = vld [vmem:[#allocation8 + $0x10] sm:$0xff]  }
  0x4e   :  { %v518_v16 = vld [vmem:[#allocation8 + $0x18] sm:$0xff]   ;;  %v519_v17 = vld [vmem:[#allocation8 + $0x20] sm:$0xff]   ;;  %v520_v18 = vld [vmem:[#allocation8 + $0x28] sm:$0xff]  }
  0x4f   :  { %v405_v19 = vld [vmem:[%s798_s2] ss:$0 sm:$0xff]  ;;  %v521_v27 = vld [vmem:[#allocation8 + $0x30] sm:$0xff]   ;;  %v522_v28 = vld [vmem:[#allocation8 + $0x38] sm:$0xff]  }
  0x50   :  { %451 = vmatpush3.bf16.msra.mxu0 %v506_v2  ;;  %459 = vmatpush3.bf16.msra.mxu1 %v508_v6  ;;  %v409_v29 = vld [vmem:[%s800_s4] ss:$0 sm:$0xff]  ;;  %s653_s4 = smov [#allocation10]  }
  0x51   :  { %476 = vmatprep.subr.bf16.mxu0 %v651_v0  ;;  %460 = vmatprep.subr.bf16.mxu1 %v651_v0  ;;  %v418_v37 = vld [vmem:[%s802_s6] ss:$0 sm:$0xff]  ;;  %s394_s28 = sshll.u32 %s653_s4, 4  ;;  %s395_s28 = int_to_ptr.vmem [resolvable:$true] %s394_s28 }
  0x52   :  { %s615_s6 = scalar_lea.vmem %s395_s28, 64  ;;  %p620_p5 = scmp.lt.s32.totalorder %s395_s28, %s395_s28 }
  0x53   :  { %453 = vmatmul.mubr.msk.bf16.vlgmr.msra.gmra.mrb[0].mxu0 %vm106_vm1, %v82_v5  ;;  %p616_p4 = scmp.ne.s32.totalorder %s395_s28, %s615_s6  ;;  %p621_p6 = scmp.lt.s32.totalorder %s615_s6, %s615_s6 }
  0x54   :  { %492 = vmatprep.mubr.msk.bf16.mxu0 %vm652_vm0, %v651_v0  ;;  %461 = vmatpush3.bf16.msra.mxu1 %v509_v7 }
  0x55   :  { %462 = vmatprep.subr.bf16.mxu1 %v651_v0  ;;  %477 = vmatpush3.bf16.msra.mxu0 %v515_v13  ;;  %p622_p7 = por %p621_p6, %p620_p5 }
  0x56   :  { %478 = vmatprep.subr.bf16.mxu0 %v651_v0 }
  0x57   :  { %p623_p8 = pnand %p622_p7, %p616_p4 }
  0x58   :  { %463 = vmatpush3.bf16.msra.mxu1 %v510_v8 }
  0x59   :  { %464 = vmatprep.subr.bf16.mxu1 %v651_v0  ;;  %479 = vmatpush3.bf16.msra.mxu0 %v516_v14 }
  0x5a   :  { %480 = vmatprep.subr.bf16.mxu0 %v651_v0 }
  0x5c   :  { %465 = vmatpush3.bf16.msra.mxu1 %v511_v9 }
  0x5d   :  { %466 = vmatprep.subr.bf16.mxu1 %v651_v0  ;;  %481 = vmatpush3.bf16.msra.mxu0 %v517_v15 }
  0x5e   :  { %482 = vmatprep.subr.bf16.mxu0 %v651_v0 }
  0x60   :  { %467 = vmatpush3.bf16.msra.mxu1 %v512_v10 }
  0x61   :  { %468 = vmatprep.subr.bf16.mxu1 %v651_v0  ;;  %483 = vmatpush3.bf16.msra.mxu0 %v518_v16 }
  0x62   :  { %484 = vmatprep.subr.bf16.mxu0 %v651_v0 }
  0x64   :  { %469 = vmatpush3.bf16.msra.mxu1 %v513_v11 }
  0x65   :  { %470 = vmatprep.subr.bf16.mxu1 %v651_v0  ;;  %485 = vmatpush3.bf16.msra.mxu0 %v519_v17 }
  0x66   :  { %486 = vmatprep.subr.bf16.mxu0 %v651_v0 }
  0x68   :  { %471 = vmatpush3.bf16.msra.mxu1 %v514_v12 }
  0x69   :  { %487 = vmatpush3.bf16.msra.mxu0 %v520_v18 }
  0x6a   :  { %488 = vmatprep.subr.bf16.mxu0 %v651_v0 }
  0x6d   :  { %489 = vmatpush3.bf16.msra.mxu0 %v521_v27 }
  0x6e   :  { %490 = vmatprep.subr.bf16.mxu0 %v651_v0 }
  0x71   :  { %491 = vmatpush3.bf16.msra.mxu0 %v522_v28 }
 0x126   :  { %v144_v20 = vpop.f32.mrb[0].mxu0 }
 0x127   :  { %v145_v21 = vadd.f32 %v405_v19, %v144_v20  ;;  %v454_v22 = vpop.f32.mrb[1].mxu0 }
 0x128   :  { %v147_v23 = vpop.f32.mrb[2].mxu0 }
 0x129   :  { %v150_v24 = vmax.f32 %v145_v21, 0.0  ;;  %v455_v25 = vpop.f32.mrb[3].mxu0 }
 0x12b   :  { %v151_v26 = vpack.c.bf16 %v150_v24, %v150_v24 }
 0x12d   :  { %473 = vmatmul.mubr.bf16.vlgmr.msra.gmra.mrb[0].mxu1 %v151_v26 }
 0x200   :  { %v257_v30 = vpop.f32.mrb[0].mxu1 }
 0x201   :  { %v258_v31 = vadd.f32 %v409_v29, %v257_v30  ;;  %v474_v32 = vpop.f32.mrb[1].mxu1 }
 0x202   :  { %v260_v33 = vpop.f32.mrb[2].mxu1 }
 0x203   :  { %v263_v34 = vmax.f32 %v258_v31, 0.0  ;;  %v475_v35 = vpop.f32.mrb[3].mxu1 }
 0x205   :  { %v264_v36 = vpack.c.bf16 %v263_v34, %v263_v34 }
 0x207   :  { %493 = vmatmul.mubr.bf16.vlgmr.msra.gmra.mrb[4].mxu0 %v264_v36 }
 0x2da   :  { %v370_v38 = vpop.f32.mrb[4].mxu0 }
 0x2db   :  { %v371_v39 = vadd.f32 %v418_v37, %v370_v38  ;;  %v494_v40 = vpop.f32.mrb[5].mxu0 }
 0x2dc   :  { %v373_v41 = vpop.f32.mrb[6].mxu0 }
 0x2dd   :  { %376 = vmax.xlane.f32.xlu0 %v371_v39  ;;  %v495_v42 = vpop.f32.mrb[7].mxu0 }
 0x36a   :  { %v377_v43 = vpop.xlane.xlu0 %376 }
 0x36b   :  { %v378_v44 = vsub.f32 %v371_v39, %v377_v43 }
 0x36d   :  { %v379_v45 = vmul.f32 1.442695, %v378_v44 }
 0x36f   :  { %523 = vpow2.f32 %v379_v45 }
 0x379   :  { %v524_v46 = vpop.eup %523 }
 0x37a   :  { %381 = vadd.xlane.f32.xlu0 %v524_v46 }
 0x407   :  { %v382_v47 = vpop.xlane.xlu0 %381 }
 0x408   :  { %525 = vlog2.f32 %v382_v47 }
 0x412   :  { %v526_v48 = vpop.eup %525 }
 0x413   :  { %v384_v49 = vmul.f32 0.6931472, %v526_v48 }
 0x415   :  { %v385_v50 = vsub.f32 %v378_v44, %v384_v49 }
 0x417   :  { %v386_v51 = vpack.c.bf16 %v385_v50, %v385_v50 }
 0x419   :  { %387 = vst [vmem:[#allocation10] sm:$0xf] %v386_v51 }
 0x41a   :  { %626 = shalt.err (!%p623_p8)
}
 0x41b   :  { %s627_s8 = scalar_lea.hbm %s803_s7, 64 }
 0x41c   :  { %p628_p9 = scmp.ne.s32.totalorder %s803_s7, %s627_s8  ;;  %p631_p10 = scmp.lt.u32.totalorder %s627_s8, %s803_s7 }
 0x41e   :  { %p633_p11 = pnand %p631_p10, %p628_p9 }
 0x420   :  { %636 = shalt.err (!%p633_p11)
}
 0x421   :  { %397 = dma.vmem_to_hbm [thread:$0]  %s395_s28, 64, %s803_s7, [#allocation4]  }
 0x422   :  { %643 = dma.done.wait [#allocation4], 64  }
 0x423   :  { %644 = vsyncadd [#allocation4], 4294967232 }
 0x424   :  { %401 = vsyncpa [#allocation3], 1 }
 0x425   :  { %402 = vsyncpa [#allocation6], 1 }
 0x426   :  { %403 = vsyncpa [#allocation9], 1 }
 0x427   :  { %404 = vsyncpa [#allocation4], 1 }

</bundles_post_ra>
